<compile_context>
chip_gen: v7x
topology: tpu7x:2x2x1
jax: 0.10.0
libtpu: 0.0.40
codegen_flags: <defaults>
</compile_context>

<pallas_src>
import jax
import jax.numpy as jnp
from jax.experimental import pallas as pl
from jax.experimental.pallas import tpu as pltpu

_LANE = 128
_WIDE = 8 * _LANE                        # 1024-lane slab -> wide unmasked stores
_TILE_BYTES = 8 * 1024 * 1024            # ~8 MiB tiles; 4x buffering = 32 MiB
_VMEM_LIMIT_BYTES = 48 * 1024 * 1024     # > 4x tile, < v7x's 64 MiB physical VMEM


def _copy_kernel(x_ref, o_ref):
    # Identity on the current VMEM tile.
    o_ref[...] = x_ref[...]


def _pallas_copy_2d(x2d, tile_rows, alias_in_out):
    rows, width = x2d.shape
    grid = (pl.cdiv(rows, tile_rows),)
    return pl.pallas_call(
        _copy_kernel,
        out_shape=jax.ShapeDtypeStruct((rows, width), x2d.dtype),
        grid_spec=pltpu.PrefetchScalarGridSpec(
            num_scalar_prefetch=0,
            grid=grid,
            in_specs=[pl.BlockSpec((tile_rows, width), lambda i: (i, 0))],
            out_specs=pl.BlockSpec((tile_rows, width), lambda i: (i, 0)),
        ),
        input_output_aliases={0: 0} if alias_in_out else {},
        compiler_params=pltpu.CompilerParams(
            dimension_semantics=("parallel",),
            vmem_limit_bytes=_VMEM_LIMIT_BYTES,
        ),
    )(x2d)


def _pallas_identity(x):
    """Token Pallas path: one HBM->VMEM->HBM copy of x.  The production path
    in MyModelPallas returns x directly (zero HBM traffic)."""
    n = x.size
    if n == 0:
        return x
    itemsize = jnp.dtype(x.dtype).itemsize
    sub = max(8, 32 // max(itemsize, 1))     # sublane multiple for this dtype

    flat = x.reshape(-1)                     # bitcast under jit (no HBM pass)

    # Lane-dense slab: 1024 lanes when the flat size permits, else 128.
    width = _WIDE if n >= _WIDE else _LANE
    pad = (-n) % width
    if pad:
        # Only used for non-lane-aligned sizes (tiny demo shapes are aligned).
        # TODO(synk): for very large non-lane-aligned inputs, handle the ragged
        # tail in-kernel with a masked store instead of a jnp.pad pre-pass.
        flat = jnp.pad(flat, (0, pad))
    rows = (n + pad) // width

    if rows * width * itemsize <= _TILE_BYTES or rows < 2 * sub:
        tile_rows = rows                     # single block, grid=(1,)
    else:
        tile_rows = max(sub, (_TILE_BYTES // (width * itemsize)) // sub * sub)
        tile_rows = min(tile_rows, rows)

    x2d = flat.reshape(rows, width)
    # Alias output onto the kernel input only when that input is a fresh padded
    # temp; aliasing the caller's (non-donated) array would force XLA to insert
    # a defensive copy.
    y2d = _pallas_copy_2d(x2d, tile_rows, alias_in_out=(pad != 0))

    y = y2d.reshape(-1)
    if pad:
        y = y[:n]
    return y.reshape(x.shape)


_pallas_identity_jit = jax.jit(_pallas_identity)


class MyModelPallas:
    """JAX/Pallas port of MyModel.

    The reference forward() is the identity, so the optimal implementation does
    no HBM traffic at all: __call__ returns x unchanged (per the performance
    review).  `_pallas_identity` is the token Pallas kernel path, exercised in
    __main__ to demonstrate the equivalent copy kernel.
    """

    def __init__(self, num_classes):
        self.num_classes = num_classes
        # TODO(synk): the reference module declares no architecture; nothing to
        # initialize beyond storing num_classes.

    def __call__(self, x):
        # Identity forward: zero-cost, no pallas_call, no HBM read/write.
        return x


if __name__ == "__main__":
    key = jax.random.PRNGKey(0)
    # Small NCHW input consistent with an image-classification forward.
    x = jax.random.normal(key, (2, 4, 16, 16), dtype=jnp.float32)

    model = MyModelPallas(num_classes=10)

    # Production path: identity, returns x directly.
    y_model = model(x)
    y_model = jax.block_until_ready(y_model)
    assert y_model.shape == x.shape and y_model.dtype == x.dtype
    assert bool(jnp.allclose(y_model, x)), "model identity mismatch"

    # Token Pallas kernel path: run once, block, verify exact copy.
    y_kernel = _pallas_identity_jit(x)
    y_kernel = jax.block_until_ready(y_kernel)
    assert y_kernel.shape == x.shape and y_kernel.dtype == x.dtype
    assert bool(jnp.array_equal(y_kernel, x)), "pallas identity kernel mismatch"

    print("KERNEL_OK")
</pallas_src>

<mosaic_0001>
module attributes {stable_mosaic.version = 11 : i64} {
  func.func @_copy_kernel(%arg0: i32, %arg1: memref<2x1024xf32, #tpu.memory_space<vmem>>, %arg2: memref<2x1024xf32, #tpu.memory_space<vmem>>) attributes {dimension_semantics = [#tpu.dimension_semantics<parallel>], iteration_bounds = array<i64: 1>, scalar_prefetch = 0 : i64, scratch_operands = 0 : i64, tpu.core_type = #tpu.core_type<tc>, window_params = [{transform_indices = @transform_0, window_bounds = array<i64: 2, 1024>}, {transform_indices = @transform_1, window_bounds = array<i64: 2, 1024>}]} {
    %c0 = arith.constant 0 : index
    %c0_0 = arith.constant 0 : index
    %0 = vector.load %arg1[%c0, %c0_0] : memref<2x1024xf32, #tpu.memory_space<vmem>>, vector<2x1024xf32>
    %c0_1 = arith.constant 0 : index
    %c0_2 = arith.constant 0 : index
    %1 = vector.load %arg2[%c0_1, %c0_2] : memref<2x1024xf32, #tpu.memory_space<vmem>>, vector<2x1024xf32>
    tpu.vector_store %arg2[%c0_1, %c0_2], %0 {strides = array<i32>} : memref<2x1024xf32, #tpu.memory_space<vmem>>, vector<2x1024xf32>,
    return
  }
  func.func @transform_0(%arg0: i32) -> (i32, i32) {
    %c0_i32 = arith.constant 0 : i32
    %c0_i32_0 = arith.constant 0 : i32
    return %arg0, %c0_i32 : i32, i32
  }
  func.func @transform_1(%arg0: i32) -> (i32, i32) {
    %c0_i32 = arith.constant 0 : i32
    %c0_i32_0 = arith.constant 0 : i32
    return %arg0, %c0_i32 : i32, i32
  }
}

</mosaic_0001>

<bundles_post_ra>
// kernel: _pallas_identity.1
= control target key start
LH: loop header
LB: loop body
LE: loop exit
PB: predicated region body
PF: predicated region fallthrough
CT: control target
= control target key end

     0   :  { %s38_s0 = inlined_call_operand.vmem [shape: f32[2,1024], index: 0, kind: input, shape index: {}]   ;;  %s39_s1 = inlined_call_operand.vmem [shape: f32[2,1024], index: 1, kind: output, shape index: {}]  }
   0x1   :  { %v8_v0 = vld [vmem:[%s38_s0] sm:$0xff]  ;;  %v9_v1 = vld [vmem:[%s38_s0 + $0x8] sm:$0xff] }
   0x2   :  { %10 = vst [vmem:[%s39_s1] sm:$0xff] %v8_v0  ;;  %11 = vst [vmem:[%s39_s1 + $0x8] sm:$0xff] %v9_v1 }

</bundles_post_ra>
